<compile_context>
chip_gen: v5e
topology: v5e:2x2
jax: 0.10.0
libtpu: 0.0.40
codegen_flags: <defaults>
</compile_context>

<pallas_src>
import jax
import jax.numpy as jnp
from jax import lax
from jax.experimental import pallas as pl
from jax.experimental.pallas import tpu as pltpu


def _make_kernel(B, S, E, identity_value):
    """Kernel factory; B/S/E and the value-mode flag are static."""

    def kernel(alpha_ref, x_ref, w_ref, o_ref):
        x3 = x_ref[...]                                # (B, S, E)
        x2 = x3.reshape(B * S, E)                      # merge leading dims (layout no-op)
        w = w_ref[...]                                 # (E, 2E) or (E, 3E), pre-transposed

        # One MXU pass for all projections of all B*S rows; beta is already folded
        # into the query columns of w.
        proj = jnp.dot(x2, w, preferred_element_type=jnp.float32)   # (B*S, 2E|3E)
        q = proj[:, :E].reshape(B, S, E)
        k = proj[:, E:2 * E].reshape(B, S, E)

        # scores (beta already applied via the fused weight)
        s = jnp.einsum("bqe,bke->bqk", q, k, preferred_element_type=jnp.float32)
        s = s - jnp.max(s, axis=-1, keepdims=True)
        p = jnp.exp(s)
        # softmax denominator reciprocal on the EUP
        p = p * pl.reciprocal(jnp.sum(p, axis=-1, keepdims=True), approx=True)

        if identity_value:
            v = x3.astype(jnp.float32)                 # Wv == I: skip the matmul
        else:
            v = proj[:, 2 * E:].reshape(B, S, E)

        att = jnp.einsum("bqk,bke->bqe", p, v, preferred_element_type=jnp.float32)
        # alpha applied once here (covers alpha * values in both modes)
        y = alpha_ref[0] * att + x3.astype(jnp.float32)

        # TODO(synk): no epsilon in the L2 norm, matching the PyTorch module
        # (an all-zero row would produce inf/nan in both implementations).
        inv_norm = lax.rsqrt(jnp.sum(y * y, axis=-1, keepdims=True))
        o_ref[...] = (y * inv_norm).astype(o_ref.dtype)

    return kernel


def simple_attention(x, wq, wk, wv, alpha, beta=1.0, value="identity"):
    """x: (B, S, E). wq/wk/wv: (E, E) nn.Linear weights. alpha: scalar or (1,)."""
    B, S, E = x.shape
    identity = (value == "identity")

    # Wrapper-side weight preprocessing (free at these sizes, keeps XLU/copies out
    # of the kernel): pre-transpose (Linear is x @ W.T), fold beta into Wq, and
    # fuse along the output dimension so the kernel does a single matmul.
    parts = [(beta * wq).T, wk.T]
    if not identity:
        parts.append(wv.T)
    w_fused = jnp.concatenate(parts, axis=1).astype(x.dtype)   # (E, 2E) or (E, 3E)

    alpha_arr = jnp.asarray(alpha, jnp.float32).reshape(1)

    return pl.pallas_call(
        _make_kernel(B, S, E, identity),
        out_shape=jax.ShapeDtypeStruct((B, S, E), x.dtype),
        grid=(1,),                                      # whole problem in one step
        in_specs=[
            pl.BlockSpec(memory_space=pltpu.SMEM),                        # alpha
            pl.BlockSpec((B, S, E), lambda i: (0, 0, 0)),                 # x (all batches)
            pl.BlockSpec(w_fused.shape, lambda i: (0, 0)),                # fused weights
        ],
        out_specs=pl.BlockSpec((B, S, E), lambda i: (0, 0, 0)),
        compiler_params=pltpu.CompilerParams(
            dimension_semantics=("arbitrary",)),
    )(alpha_arr, x, w_fused)


def reference(x, wq, wk, wv, alpha, beta=1.0):
    """Pure-JAX reference mirroring the PyTorch forward."""
    q = x @ wq.T
    k = x @ wk.T
    v = alpha * (x @ wv.T)
    s = beta * jnp.einsum("bqe,bke->bqk", q, k)
    p = jax.nn.softmax(s, axis=-1)
    att = jnp.einsum("bqk,bke->bqe", p, v)
    y = att + x
    return y / jnp.linalg.norm(y, axis=-1, keepdims=True)


if __name__ == "__main__":
    B, S, E = 2, 8, 32
    beta = 1.5

    key = jax.random.PRNGKey(0)
    kx, kq, kk, kv, ka = jax.random.split(key, 5)

    x = jax.random.normal(kx, (B, S, E), dtype=jnp.float32)
    bound = 1.0 / jnp.sqrt(E)
    wq = jax.random.uniform(kq, (E, E), minval=-bound, maxval=bound, dtype=jnp.float32)
    wk = jax.random.uniform(kk, (E, E), minval=-bound, maxval=bound, dtype=jnp.float32)

    # --- identity value mode (Wv = I, learned scalar alpha) ---
    wv_id = jnp.eye(E, dtype=jnp.float32)
    alpha_id = jax.random.normal(ka, (1,), dtype=jnp.float32)      # torch.randn(1)

    out_id = simple_attention(x, wq, wk, wv_id, alpha_id, beta=beta, value="identity")
    out_id = jax.block_until_ready(out_id)
    ref_id = reference(x, wq, wk, wv_id, alpha_id[0], beta=beta)
    assert out_id.shape == (B, S, E)
    assert jnp.allclose(out_id, ref_id, atol=2e-3, rtol=2e-3), "identity mode mismatch"

    # --- generic value mode (learned Wv, alpha fixed to 1.0) ---
    wv_gen = jax.random.uniform(kv, (E, E), minval=-bound, maxval=bound, dtype=jnp.float32)
    alpha_gen = jnp.ones((1,), dtype=jnp.float32)

    out_gen = simple_attention(x, wq, wk, wv_gen, alpha_gen, beta=beta, value="learned")
    out_gen = jax.block_until_ready(out_gen)
    ref_gen = reference(x, wq, wk, wv_gen, alpha_gen[0], beta=beta)
    assert jnp.allclose(out_gen, ref_gen, atol=2e-3, rtol=2e-3), "generic mode mismatch"

    print("KERNEL_OK")
</pallas_src>

<mosaic_0001>
module attributes {stable_mosaic.version = 11 : i64} {
  func.func @kernel(%arg0: i32, %arg1: memref<1xf32, #tpu.memory_space<smem>>, %arg2: memref<2x8x32xf32, #tpu.memory_space<vmem>>, %arg3: memref<32x64xf32, #tpu.memory_space<vmem>>, %arg4: memref<2x8x32xf32, #tpu.memory_space<vmem>>) attributes {dimension_semantics = [#tpu.dimension_semantics<arbitrary>], iteration_bounds = array<i64: 1>, scalar_prefetch = 0 : i64, scratch_operands = 0 : i64, tpu.core_type = #tpu.core_type<tc>, window_params = [{transform_indices = @transform_0, window_bounds = array<i64: 1>}, {pipeline_mode = #tpu.pipeline_mode<synchronous>, transform_indices = @transform_1, window_bounds = array<i64: 2, 8, 32>}, {pipeline_mode = #tpu.pipeline_mode<synchronous>, transform_indices = @transform_2, window_bounds = array<i64: 32, 64>}, {pipeline_mode = #tpu.pipeline_mode<synchronous>, transform_indices = @transform_3, window_bounds = array<i64: 2, 8, 32>}]} {
    %c0 = arith.constant 0 : index
    %c0_0 = arith.constant 0 : index
    %c0_1 = arith.constant 0 : index
    %0 = vector.load %arg2[%c0, %c0_0, %c0_1] : memref<2x8x32xf32, #tpu.memory_space<vmem>>, vector<2x8x32xf32>
    %1 = vector.shape_cast %0 : vector<2x8x32xf32> to vector<16x32xf32>
    %c0_2 = arith.constant 0 : index
    %c0_3 = arith.constant 0 : index
    %2 = vector.load %arg3[%c0_2, %c0_3] : memref<32x64xf32, #tpu.memory_space<vmem>>, vector<32x64xf32>
    %cst = arith.constant dense<0.000000e+00> : vector<16x64xf32>
    %3 = tpu.matmul %1, %2, %cst {dimension_numbers = #tpu.dot_dimension_numbers<[1], [0], [0], [1], [0, 0, 1, 1], [], []>} : vector<16x32xf32>, vector<32x64xf32>, vector<16x64xf32> -> vector<16x64xf32>
    %4 = vector.extract_strided_slice %3 {offsets = [0, 0], sizes = [16, 32], strides = [1, 1]} : vector<16x64xf32> to vector<16x32xf32>
    %5 = vector.shape_cast %4 : vector<16x32xf32> to vector<2x8x32xf32>
    %6 = vector.extract_strided_slice %3 {offsets = [0, 32], sizes = [16, 32], strides = [1, 1]} : vector<16x64xf32> to vector<16x32xf32>
    %7 = vector.shape_cast %6 : vector<16x32xf32> to vector<2x8x32xf32>
    "tpu.trace_start"() <{level = 10 : i32, message = "bqe,bke->bqk"}> : () -> ()
    %cst_4 = arith.constant dense<0.000000e+00> : vector<2x8x8xf32>
    %8 = tpu.matmul %5, %7, %cst_4 {dimension_numbers = #tpu.dot_dimension_numbers<[2], [2], [1], [1], [0, 0, 0, 1, 1, 1], [0], [0]>} : vector<2x8x32xf32>, vector<2x8x32xf32>, vector<2x8x8xf32> -> vector<2x8x8xf32>
    "tpu.trace_stop"() : () -> ()
    %cst_5 = arith.constant dense<0xFF800000> : vector<2x8xf32>
    %9 = vector.multi_reduction <maximumf>, %8, %cst_5 [2] : vector<2x8x8xf32> to vector<2x8xf32>
    %10 = vector.shape_cast %9 : vector<2x8xf32> to vector<2x8x1xf32>
    %11 = vector.broadcast %10 : vector<2x8x1xf32> to vector<2x8x8xf32>
    %12 = arith.subf %8, %11 : vector<2x8x8xf32>
    %13 = math.exp %12 : vector<2x8x8xf32>
    %cst_6 = arith.constant dense<0.000000e+00> : vector<2x8xf32>
    %14 = vector.multi_reduction <add>, %13, %cst_6 [2] : vector<2x8x8xf32> to vector<2x8xf32>
    %15 = vector.shape_cast %14 : vector<2x8xf32> to vector<2x8x1xf32>
    %16 = tpu.reciprocal %15 {approx = true} : vector<2x8x1xf32> -> vector<2x8x1xf32>
    %17 = vector.broadcast %16 : vector<2x8x1xf32> to vector<2x8x8xf32>
    %18 = arith.mulf %13, %17 : vector<2x8x8xf32>
    "tpu.trace_start"() <{level = 10 : i32, message = "bqk,bke->bqe"}> : () -> ()
    %cst_7 = arith.constant dense<0.000000e+00> : vector<2x8x32xf32>
    %19 = tpu.matmul %18, %0, %cst_7 {dimension_numbers = #tpu.dot_dimension_numbers<[2], [1], [1], [2], [0, 0, 0, 1, 1, 2], [0], [0]>} : vector<2x8x8xf32>, vector<2x8x32xf32>, vector<2x8x32xf32> -> vector<2x8x32xf32>
    "tpu.trace_stop"() : () -> ()
    %c0_8 = arith.constant 0 : index
    %20 = memref.load %arg1[%c0_8] : memref<1xf32, #tpu.memory_space<smem>>
    %21 = vector.broadcast %20 : f32 to vector<2x8x32xf32>
    %22 = arith.mulf %21, %19 : vector<2x8x32xf32>
    %23 = arith.addf %22, %0 : vector<2x8x32xf32>
    %24 = arith.mulf %23, %23 : vector<2x8x32xf32>
    %cst_9 = arith.constant dense<0.000000e+00> : vector<2x8xf32>
    %25 = vector.multi_reduction <add>, %24, %cst_9 [2] : vector<2x8x32xf32> to vector<2x8xf32>
    %26 = vector.shape_cast %25 : vector<2x8xf32> to vector<2x8x1xf32>
    %27 = math.rsqrt %26 : vector<2x8x1xf32>
    %28 = vector.broadcast %27 : vector<2x8x1xf32> to vector<2x8x32xf32>
    %29 = arith.mulf %23, %28 : vector<2x8x32xf32>
    %c0_10 = arith.constant 0 : index
    %c0_11 = arith.constant 0 : index
    %c0_12 = arith.constant 0 : index
    %30 = vector.load %arg4[%c0_10, %c0_11, %c0_12] : memref<2x8x32xf32, #tpu.memory_space<vmem>>, vector<2x8x32xf32>
    tpu.vector_store %arg4[%c0_10, %c0_11, %c0_12], %29 {strides = array<i32>} : memref<2x8x32xf32, #tpu.memory_space<vmem>>, vector<2x8x32xf32>,
    return
  }
  func.func @transform_0(%arg0: i32) -> i32 {
    %c0_i32 = arith.constant 0 : i32
    %c0_i32_0 = arith.constant 0 : i32
    return %c0_i32 : i32
  }
  func.func @transform_1(%arg0: i32) -> (i32, i32, i32) {
    %c0_i32 = arith.constant 0 : i32
    %c0_i32_0 = arith.constant 0 : i32
    %c0_i32_1 = arith.constant 0 : i32
    %c0_i32_2 = arith.constant 0 : i32
    return %c0_i32, %c0_i32_0, %c0_i32_1 : i32, i32, i32
  }
  func.func @transform_2(%arg0: i32) -> (i32, i32) {
    %c0_i32 = arith.constant 0 : i32
    %c0_i32_0 = arith.constant 0 : i32
    %c0_i32_1 = arith.constant 0 : i32
    return %c0_i32, %c0_i32_0 : i32, i32
  }
  func.func @transform_3(%arg0: i32) -> (i32, i32, i32) {
    %c0_i32 = arith.constant 0 : i32
    %c0_i32_0 = arith.constant 0 : i32
    %c0_i32_1 = arith.constant 0 : i32
    %c0_i32_2 = arith.constant 0 : i32
    return %c0_i32, %c0_i32_0, %c0_i32_1 : i32, i32, i32
  }
}

</mosaic_0001>

<bundles_post_ra>
// kernel: tpu_custom_call.1
= control target key start
LH: loop header
LB: loop body
LE: loop exit
PB: predicated region body
PF: predicated region fallthrough
CT: control target
= control target key end

     0   :  { %9 = vsyncpa [#allocation4], 0  ;;  %s432_s0 = inlined_call_operand.<no memory space> [shape: f32[1], index: 0, kind: input, shape index: {}]   ;;  %s433_s1 = inlined_call_operand.hbm [shape: f32[2,8,32], index: 1, kind: input, shape index: {}]   ;;  %s434_s2 = inlined_call_operand.hbm [shape: f32[32,64], index: 2, kind: input, shape index: {}]   ;;  %s435_s3 = inlined_call_operand.hbm [shape: f32[2,8,32], index: 3, kind: output, shape index: {}]  }
   0x1   :  { %10 = vsyncpa [#allocation7], 0 }
   0x2   :  { %11 = vsyncpa [#allocation5], 0  ;;  %s18_s14 = sshll.u32 %s433_s1, 4  ;;  %s369_s15 = smov [#allocation3]   ;;  %s19_s14 = int_to_ptr.hbm [resolvable:$true] %s18_s14 }
   0x3   :  { %s20_s16 = sshll.u32 %s369_s15, 4  ;;  %s31_s19 = sshll.u32 %s434_s2, 4  ;;  %s21_s16 = int_to_ptr.vmem [resolvable:$true] %s20_s16  ;;  %s32_s19 = int_to_ptr.hbm [resolvable:$true] %s31_s19 }
   0x4   :  { %s370_s20 = smov 128   ;;  %s371_s21 = smov 8  }
   0x5   :  { %26 = dma.hbm_to_vmem [thread:$0]  %s19_s14, 256, %s21_s16, [#allocation4], %s370_s20, %s370_s20, %s371_s21  }
   0x6   :  { %s372_s22 = smov [#allocation6]  }
   0x7   :  { %s33_s23 = sshll.u32 %s372_s22, 4  ;;  %s34_s23 = int_to_ptr.vmem [resolvable:$true] %s33_s23 }
   0x8   :  { %39 = dma.hbm_to_vmem [thread:$0]  %s32_s19, 512, %s34_s23, [#allocation7], %s370_s20, %s370_s20, %s371_s21  }
   0x9   :  { %363 = dma.done.wait [#allocation4], 256  }
   0xa   :  { %364 = vsyncadd [#allocation4], 4294967040 }
   0xb   :  { %365 = dma.done.wait [#allocation7], 512  }
   0xc   :  { %366 = vsyncadd [#allocation7], 4294966784  ;;  %v53_v0 = vld [vmem:[#allocation6 + $0x18] sm:$0xff]  ;;  %v52_v1 = vld [vmem:[#allocation6 + $0x10] sm:$0xff]  ;;  %vm54_vm0 = vcmask 261120   ;;  %s373_s1 = smov 96   ;;  %v208_v30 = vstv %s432_s0 }
   0xd   :  { %73 = vmatpush.msra.mxu0 %v53_v0  ;;  %v48_v2 = vld [vmem:[#allocation3] sm:$0xff]  ;;  %v51_v3 = vld [vmem:[#allocation6 + $0x8] sm:$0xff]  ;;  %v49_v4 = vld [vmem:[#allocation3 + $0x8] sm:$0xff]  ;;  %vm138_vm1 = vcmask 64512   ;;  %s374_s0 = smov [#allocation8]   ;;  %s251_s28 = sshll.u32 %s435_s3, 4  ;;  %s252_s28 = int_to_ptr.hbm [resolvable:$true] %s251_s28 }
   0xe   :  { %179 = vmatpush.msra.mxu3 %v48_v2  ;;  %v50_v5 = vld [vmem:[#allocation6] sm:$0xff]  ;;  %s249_s25 = sshll.u32 %s374_s0, 4  ;;  %s250_s25 = int_to_ptr.vmem [resolvable:$true] %s249_s25 }
   0xf   :  { %74 = vmatpush.msra.mxu0 %v52_v1 }
  0x10   :  { %202 = vmatpush.msrb.mxu3 %v49_v4 }
  0x11   :  { %75 = vmatpush.msra.mxu0 %v51_v3 }
  0x13   :  { %76 = vmatpush.msra.mxu0 %v50_v5 }
  0x14   :  { %265 = vmatmul.msk.f32.vlgmr.msra.gmra.mxu0 %vm54_vm0, %v48_v2 }
  0x1c   :  { %266 = vmatmul.msk.f32.gmra.mxu0 %vm54_vm0, %v49_v4 }
  0x91   :  { %v78_v6 = vpop.f32.mrf.mxu0 }
  0x92   :  { %85 = vrot.lane.b32.xlu0 %v78_v6, %s373_s1 }
  0x99   :  { %v81_v7 = vpop.f32.mrf.mxu0 }
  0x9a   :  { %112 = vrot.lane.b32.xlu0 %v81_v7, %s373_s1 }
 0x104   :  { %v86_v8 = vpop.permute.xlu0 %85 }
 0x105   :  { %267 = vmatpush.xpose.msk.msra.mxu1 %vm54_vm0, %v86_v8 }
 0x108   :  { %268 = vmatmul.msk.f32.vlgmr.msra.gmra.mxu1 %vm54_vm0, %v78_v6 }
 0x10c   :  { %v113_v9 = vpop.permute.xlu0 %112 }
 0x10d   :  { %269 = vmatpush.xpose.msk.msra.mxu2 %vm54_vm0, %v113_v9 }
 0x110   :  { %270 = vmatmul.msk.f32.vlgmr.msra.gmra.mxu2 %vm54_vm0, %v81_v7 }
 0x185   :  { %v108_v10 = vpop.f32.mrf.mxu1 }
 0x186   :  { %v139_v11 = vsel %vm138_vm1, %v108_v10, -inf }
 0x187   :  { %140 = vmax.xlane.f32.xlu1 %v139_v11 }
 0x193   :  { %v135_v12 = vpop.f32.mrf.mxu2 }
 0x194   :  { %v142_v13 = vsel %vm138_vm1, %v135_v12, -inf }
 0x195   :  { %143 = vmax.xlane.f32.xlu1 %v142_v13 }
 0x1fa   :  { %v141_v14 = vpop.xlane.xlu1 %140 }
 0x1fb   :  { %v145_v15 = vsub.f32 %v108_v10, %v141_v14 }
 0x1fd   :  { %v147_v16 = vmul.f32 1.442695, %v145_v15 }
 0x1ff   :  { %279 = vpow2.f32 %v147_v16 }
 0x205   :  { %v280_v17 = vpop.eup %279 }
 0x206   :  { %v151_v18 = vsel %vm138_vm1, %v280_v17, 0.0 }
 0x207   :  { %152 = vadd.xlane.f32.xlu2 %v151_v18 }
 0x208   :  { %v144_v19 = vpop.xlane.xlu1 %143 }
 0x209   :  { %v146_v20 = vsub.f32 %v135_v12, %v144_v19 }
 0x20b   :  { %v149_v21 = vmul.f32 1.442695, %v146_v20 }
 0x20d   :  { %281 = vpow2.f32 %v149_v21 }
 0x213   :  { %v282_v22 = vpop.eup %281 }
 0x214   :  { %v154_v23 = vsel %vm138_vm1, %v282_v22, 0.0 }
 0x215   :  { %155 = vadd.xlane.f32.xlu2 %v154_v23 }
 0x27a   :  { %v153_v24 = vpop.xlane.xlu2 %152 }
 0x27b   :  { %283 = vrcp.f32 %v153_v24 }
 0x281   :  { %v284_v25 = vpop.eup %283 }
 0x282   :  { %v159_v26 = vmul.f32 %v284_v25, %v280_v17 }
 0x284   :  { %271 = vmatmul.msk.f32.vlgmr.msra.gmra.mxu3 %vm138_vm1, %v159_v26 }
 0x288   :  { %v156_v27 = vpop.xlane.xlu2 %155 }
 0x289   :  { %285 = vrcp.f32 %v156_v27 }
 0x28f   :  { %v286_v28 = vpop.eup %285 }
 0x290   :  { %v160_v29 = vmul.f32 %v286_v28, %v282_v22 }
 0x292   :  { %272 = vmatmul.msk.f32.vlgmr.msrb.gmra.mxu3 %vm138_vm1, %v160_v29 }
 0x307   :  { %v181_v31 = vpop.f32.mrf.mxu3 }
 0x308   :  { %v209_v32 = vmul.f32 %v208_v30, %v181_v31 }
 0x30a   :  { %v211_v33 = vadd.f32 %v209_v32, %v48_v2 }
 0x30c   :  { %v213_v34 = vmul.f32 %v211_v33, %v211_v33 }
 0x30e   :  { %v215_v35 = vsel %vm54_vm0, %v213_v34, 0.0 }
 0x30f   :  { %216 = vadd.xlane.f32.xlu0 %v215_v35 }
 0x315   :  { %v204_v36 = vpop.f32.mrf.mxu3 }
 0x316   :  { %v210_v37 = vmul.f32 %v208_v30, %v204_v36 }
 0x318   :  { %v212_v38 = vadd.f32 %v210_v37, %v49_v4 }
 0x31a   :  { %v214_v39 = vmul.f32 %v212_v38, %v212_v38 }
 0x31c   :  { %v218_v40 = vsel %vm54_vm0, %v214_v39, 0.0 }
 0x31d   :  { %219 = vadd.xlane.f32.xlu1 %v218_v40 }
 0x382   :  { %v217_v41 = vpop.xlane.xlu0 %216 }
 0x383   :  { %287 = vrsqrt.f32 %v217_v41  ;;  %vm227_vm3 = vweird.f32 %v217_v41 }
 0x389   :  { %v288_v42 = vpop.eup %287 }
 0x38a   :  { %v222_v43 = vmul.f32 %v288_v42, %v217_v41  ;;  %vm228_vm2 = vweird.f32 %v288_v42 }
 0x38b   :  { %vm229_vm4 = vmor %vm227_vm3, %vm228_vm2 }
 0x38c   :  { %v223_v44 = vmul.f32 %v288_v42, %v222_v43 }
 0x38e   :  { %v224_v45 = vmul.f32 0.5, %v223_v44 }
 0x390   :  { %v225_v46 = vsub.f32 1.5, %v224_v45  ;;  %v220_v47 = vpop.xlane.xlu1 %219 }
 0x391   :  { %289 = vrsqrt.f32 %v220_v47  ;;  %vm237_vm6 = vweird.f32 %v220_v47 }
 0x392   :  { %v226_v48 = vmul.f32 %v288_v42, %v225_v46 }
 0x394   :  { %v230_v49 = vsel %vm229_vm4, %v288_v42, %v226_v48 }
 0x395   :  { %v241_v50 = vmul.f32 %v230_v49, %v211_v33 }
 0x397   :  { %v290_v51 = vpop.eup %289  ;;  %243 = vst.msk [vmem:[#allocation8] sm:$0xff] %vm54_vm0, %v241_v50 }
 0x398   :  { %v232_v52 = vmul.f32 %v290_v51, %v220_v47  ;;  %vm238_vm5 = vweird.f32 %v290_v51 }
 0x399   :  { %vm239_vm7 = vmor %vm237_vm6, %vm238_vm5 }
 0x39a   :  { %v233_v53 = vmul.f32 %v290_v51, %v232_v52 }
 0x39c   :  { %v234_v54 = vmul.f32 0.5, %v233_v53 }
 0x39e   :  { %v235_v55 = vsub.f32 1.5, %v234_v54 }
 0x3a0   :  { %v236_v56 = vmul.f32 %v290_v51, %v235_v55 }
 0x3a2   :  { %v240_v57 = vsel %vm239_vm7, %v290_v51, %v236_v56 }
 0x3a3   :  { %v242_v58 = vmul.f32 %v240_v57, %v212_v38 }
 0x3a5   :  { %244 = vst.msk [vmem:[#allocation8 + $0x8] sm:$0xff] %vm54_vm0, %v242_v58 }
 0x3a6   :  { %257 = dma.vmem_to_hbm [thread:$0]  %s250_s25, 256, %s252_s28, [#allocation5], %s370_s20, %s370_s20, %s371_s21  }
 0x3a7   :  { %367 = dma.done.wait [#allocation5], 256  }
 0x3a8   :  { %368 = vsyncadd [#allocation5], 4294967040 }
 0x3a9   :  { %262 = vsyncpa [#allocation4], 1 }
 0x3aa   :  { %263 = vsyncpa [#allocation7], 1 }
 0x3ab   :  { %264 = vsyncpa [#allocation5], 1 }

</bundles_post_ra>
